<compile_context>
chip_gen: v7x
topology: tpu7x:2x2x1
jax: 0.10.0
libtpu: 0.0.40
codegen_flags: <defaults>
</compile_context>

<pallas_src>
import functools

import jax
import jax.numpy as jnp
from jax import lax
from jax.experimental import pallas as pl
from jax.experimental.pallas import tpu as pltpu

BN_EPS = 1e-5
GN_EPS = 1e-5

_RESNET50_STAGES = ((64, 3, 1), (128, 4, 2), (256, 6, 2), (512, 3, 2))

_GEMM_PARAMS = pltpu.CompilerParams(
    dimension_semantics=("parallel", "arbitrary"),
    vmem_limit_bytes=48 * 1024 * 1024,
)


def _round_up(x, m):
    return (x + m - 1) // m * m


def _pick_tiles(M, K, N):
    # Single M block (in-kernel batch stats need every row of a column in one block).
    tm = _round_up(max(M, 1), 8)
    if tm > 1024:
        raise ValueError("fused BN epilogue assumes a single M block (M <= 1024)")
    # Single K slab for every backbone conv (K <= 4608); 2048-wide K steps for the big
    # decoder GEMMs (K in {8192, 16384}) -> <= 8 k steps, ~2 MiB B tiles.
    tk = K if K <= 4608 else 2048
    # Lane-dense N tiles; cap at 512 so B double-buffers stay small on v7x while N >= 1024
    # still yields >= 2 parallel j blocks (both TensorCores contribute).
    tn = min(_round_up(N, 128), 512)
    return tm, tk, tn


# ----------------------------------------------------------------------------
# Pallas kernel 1: conv GEMM with fused train-mode BatchNorm (+residual) + ReLU.
# Grid = (N blocks, K steps); the M axis is a single block.
# ----------------------------------------------------------------------------
def _bn_epilogue(acc, g, bt, r, *, inv_m, relu, eps):
    # acc: (tm, tn) f32, rows >= M are exactly zero (bias-free conv, zero padding).
    mean = jnp.sum(acc, axis=0, keepdims=True) * inv_m
    var = jnp.maximum(jnp.sum(acc * acc, axis=0, keepdims=True) * inv_m - mean * mean, 0.0)
    scale = g * lax.rsqrt(var + eps)
    out = acc * scale + (bt - mean * scale)
    if r is not None:
        out = out + r
    if relu:
        out = jnp.maximum(out, 0.0)
    return out


def _conv_bn_kernel(a_ref, b_ref, g_ref, bt_ref, o_ref, acc_ref, *, inv_m, relu, eps):
    k = pl.program_id(1)

    @pl.when(k == 0)
    def _():
        acc_ref[...] = jnp.zeros_like(acc_ref)

    acc_ref[...] += jnp.dot(a_ref[...], b_ref[...], preferred_element_type=jnp.float32)

    @pl.when(k == pl.num_programs(1) - 1)
    def _():
        out = _bn_epilogue(acc_ref[...], g_ref[...], bt_ref[...], None,
                           inv_m=inv_m, relu=relu, eps=eps)
        o_ref[...] = out.astype(o_ref.dtype)


def _conv_bn_res_kernel(a_ref, b_ref, g_ref, bt_ref, r_ref, o_ref, acc_ref,
                        *, inv_m, relu, eps):
    k = pl.program_id(1)

    @pl.when(k == 0)
    def _():
        acc_ref[...] = jnp.zeros_like(acc_ref)

    acc_ref[...] += jnp.dot(a_ref[...], b_ref[...], preferred_element_type=jnp.float32)

    @pl.when(k == pl.num_programs(1) - 1)
    def _():
        out = _bn_epilogue(acc_ref[...], g_ref[...], bt_ref[...],
                           r_ref[...].astype(jnp.float32),
                           inv_m=inv_m, relu=relu, eps=eps)
        o_ref[...] = out.astype(o_ref.dtype)


@functools.partial(jax.jit, static_argnames=("relu",))
def _conv_gemm_bn(a, b, gamma, beta, residual, relu=True):
    """Bias-free conv GEMM -> fused BatchNorm(batch stats) (+residual) -> ReLU."""
    M, K = a.shape
    K2, N = b.shape
    assert K == K2
    tm, tk, tn = _pick_tiles(M, K, N)
    Kp, Np = _round_up(K, tk), _round_up(N, tn)

    a = a.astype(jnp.bfloat16)
    if (tm, Kp) != (M, K):
        a = jnp.pad(a, ((0, tm - M), (0, Kp - K)))
    b = b.astype(jnp.bfloat16)
    if (Kp, Np) != (K, N):
        b = jnp.pad(b, ((0, Kp - K), (0, Np - N)))
    g = jnp.pad(gamma.astype(jnp.float32), (0, Np - N)).reshape(1, Np)
    bt = jnp.pad(beta.astype(jnp.float32), (0, Np - N)).reshape(1, Np)

    grid = (Np // tn, Kp // tk)
    a_spec = pl.BlockSpec((tm, tk), lambda j, k: (0, k))
    b_spec = pl.BlockSpec((tk, tn), lambda j, k: (k, j))
    vec_spec = pl.BlockSpec((1, tn), lambda j, k: (0, j))
    res_spec = pl.BlockSpec((tm, tn), lambda j, k: (0, j))
    out_spec = pl.BlockSpec((tm, tn), lambda j, k: (0, j))
    common = dict(
        out_shape=jax.ShapeDtypeStruct((tm, Np), jnp.bfloat16),
        grid=grid,
        out_specs=out_spec,
        scratch_shapes=[pltpu.VMEM((tm, tn), jnp.float32)],
        compiler_params=_GEMM_PARAMS,
    )
    epi = dict(inv_m=1.0 / M, relu=relu, eps=BN_EPS)

    if residual is None:
        out = pl.pallas_call(
            functools.partial(_conv_bn_kernel, **epi),
            in_specs=[a_spec, b_spec, vec_spec, vec_spec], **common,
        )(a, b, g, bt)
    else:
        r = residual.astype(jnp.bfloat16)
        if (tm, Np) != (M, N):
            r = jnp.pad(r, ((0, tm - M), (0, Np - N)))
        out = pl.pallas_call(
            functools.partial(_conv_bn_res_kernel, **epi),
            in_specs=[a_spec, b_spec, vec_spec, vec_spec, res_spec], **common,
        )(a, b, g, bt, r)
    return out[:M, :N]


# ----------------------------------------------------------------------------
# Pallas kernel 2: plain GEMM + bias epilogue (decoder / transposed-conv GEMMs).
# ----------------------------------------------------------------------------
def _mm_bias_kernel(a_ref, b_ref, bias_ref, o_ref, acc_ref):
    k = pl.program_id(1)

    @pl.when(k == 0)
    def _():
        acc_ref[...] = jnp.zeros_like(acc_ref)

    acc_ref[...] += jnp.dot(a_ref[...], b_ref[...], preferred_element_type=jnp.float32)

    @pl.when(k == pl.num_programs(1) - 1)
    def _():
        o_ref[...] = (acc_ref[...] + bias_ref[...]).astype(o_ref.dtype)


@jax.jit
def _matmul_bias(a, b, bias):
    M, K = a.shape
    K2, N = b.shape
    assert K == K2
    tm, tk, tn = _pick_tiles(M, K, N)
    Kp, Np = _round_up(K, tk), _round_up(N, tn)

    a = a.astype(jnp.bfloat16)
    if (tm, Kp) != (M, K):
        a = jnp.pad(a, ((0, tm - M), (0, Kp - K)))
    b = b.astype(jnp.bfloat16)
    if (Kp, Np) != (K, N):
        b = jnp.pad(b, ((0, Kp - K), (0, Np - N)))
    bias_p = jnp.pad(bias.astype(jnp.float32), (0, Np - N)).reshape(1, Np)

    grid = (Np // tn, Kp // tk)
    out = pl.pallas_call(
        _mm_bias_kernel,
        out_shape=jax.ShapeDtypeStruct((tm, Np), jnp.bfloat16),
        grid=grid,
        in_specs=[pl.BlockSpec((tm, tk), lambda j, k: (0, k)),
                  pl.BlockSpec((tk, tn), lambda j, k: (k, j)),
                  pl.BlockSpec((1, tn), lambda j, k: (0, j))],
        out_specs=pl.BlockSpec((tm, tn), lambda j, k: (0, j)),
        scratch_shapes=[pltpu.VMEM((tm, tn), jnp.float32)],
        compiler_params=_GEMM_PARAMS,
    )(a, b, bias_p)
    return out[:M, :N]


# ----------------------------------------------------------------------------
# Pallas kernel 3: GroupNorm(16) + ReLU (+ optional final Tanh), lane-dense layout.
# One block per sample covers all 16 groups: rows = group, lanes = Cg*HW.
# ----------------------------------------------------------------------------
def _gn_kernel(x_ref, g_ref, b_ref, o_ref, *, eps, final_tanh):
    x = x_ref[...].astype(jnp.float32)                 # (G, Cg*HW)
    mean = jnp.mean(x, axis=1, keepdims=True)
    d = x - mean
    var = jnp.mean(d * d, axis=1, keepdims=True)
    y = d * lax.rsqrt(var + eps) * g_ref[...] + b_ref[...]
    y = jnp.maximum(y, 0.0)
    if final_tanh:
        y = jnp.tanh(y)
    o_ref[...] = y.astype(o_ref.dtype)


def _groupnorm_act(x_nhwc, gamma, beta, num_groups=16, eps=GN_EPS, final_tanh=False):
    N, H, W, C = x_nhwc.shape
    G = num_groups
    Cg = C // G
    HW = H * W
    L = Cg * HW
    xg = x_nhwc.reshape(N, HW, G, Cg).transpose(0, 2, 3, 1).reshape(N * G, L)
    g_row = jnp.broadcast_to(gamma.astype(jnp.float32).reshape(G, Cg, 1),
                             (G, Cg, HW)).reshape(G, L)
    b_row = jnp.broadcast_to(beta.astype(jnp.float32).reshape(G, Cg, 1),
                             (G, Cg, HW)).reshape(G, L)
    out = pl.pallas_call(
        functools.partial(_gn_kernel, eps=float(eps), final_tanh=final_tanh),
        grid=(N,),
        in_specs=[pl.BlockSpec((G, L), lambda n: (n, 0)),
                  pl.BlockSpec((G, L), lambda n: (0, 0)),
                  pl.BlockSpec((G, L), lambda n: (0, 0))],
        out_specs=pl.BlockSpec((G, L), lambda n: (n, 0)),
        out_shape=jax.ShapeDtypeStruct((N * G, L), jnp.bfloat16),
        compiler_params=pltpu.CompilerParams(dimension_semantics=("parallel",)),
    )(xg, g_row, b_row)
    return out.reshape(N, G, Cg, HW).transpose(0, 3, 1, 2).reshape(N, H, W, C)


# ----------------------------------------------------------------------------
# Convolution glue (im2col / 1x1 fast path) — all under the single outer jit.
# ----------------------------------------------------------------------------
def _im2col(x, k, stride, pad):
    x = jnp.pad(x, ((0, 0), (pad, pad), (pad, pad), (0, 0)))
    N, Hp, Wp, C = x.shape
    OH = (Hp - k) // stride + 1
    OW = (Wp - k) // stride + 1
    Hs = stride * (OH - 1) + 1
    Ws = stride * (OW - 1) + 1
    cols = [x[:, i:i + Hs:stride, j:j + Ws:stride, :]
            for i in range(k) for j in range(k)]
    return jnp.concatenate(cols, axis=-1).reshape(N * OH * OW, k * k * C)


def conv_bn_act(x, w_mat, bn, *, k, stride, pad, relu=True, residual=None):
    """Bias-free conv -> train-mode BatchNorm (batch stats) -> (+residual) -> ReLU."""
    Nb, H, W, Cin = x.shape
    if k == 1:
        xs = x if stride == 1 else x[:, ::stride, ::stride, :]     # 1x1 fast path
        _, OH, OW, _ = xs.shape
        a = xs.reshape(Nb * OH * OW, Cin)
    else:
        a = _im2col(x, k, stride, pad)
        OH = (H + 2 * pad - k) // stride + 1
        OW = (W + 2 * pad - k) // stride + 1
    Cout = w_mat.shape[1]
    M = Nb * OH * OW
    res2d = None if residual is None else residual.reshape(M, Cout)
    y2d = _conv_gemm_bn(a, w_mat, bn["gamma"], bn["beta"], res2d, relu=relu)
    return y2d.reshape(Nb, OH, OW, Cout)


def maxpool_3x3_s2_p1(x):
    # TODO(synk): max-pool stays in lax.reduce_window glue (tiny op, no Pallas kernel).
    return lax.reduce_window(x, jnp.array(-jnp.inf, x.dtype), lax.max,
                             (1, 3, 3, 1), (1, 2, 2, 1),
                             ((0, 0), (1, 1), (1, 1), (0, 0)))


# ----------------------------------------------------------------------------
# ConvTranspose2d(k=3, s=2, p=1, op=1): sub-pixel decomposition (4 parity GEMMs).
# ----------------------------------------------------------------------------
def _deconv_s2(x, p):
    N, H, W, Cin = x.shape
    Cout = p["w00"].shape[1]
    xb = x.astype(jnp.bfloat16)
    xp = jnp.pad(xb, ((0, 0), (0, 1), (0, 1), (0, 0)))
    x_r = xp[:, :H, 1:, :]
    x_d = xp[:, 1:, :W, :]
    x_dr = xp[:, 1:, 1:, :]
    M = N * H * W
    o00 = _matmul_bias(xb.reshape(M, Cin), p["w00"], p["b"])
    o01 = _matmul_bias(jnp.concatenate([xb, x_r], axis=-1).reshape(M, 2 * Cin),
                       p["w01"], p["b"])
    o10 = _matmul_bias(jnp.concatenate([xb, x_d], axis=-1).reshape(M, 2 * Cin),
                       p["w10"], p["b"])
    o11 = _matmul_bias(jnp.concatenate([xb, x_r, x_d, x_dr], axis=-1).reshape(M, 4 * Cin),
                       p["w11"], p["b"])
    o00, o01, o10, o11 = (o.reshape(N, H, W, Cout) for o in (o00, o01, o10, o11))
    top = jnp.stack([o00, o01], axis=3)            # (N, H, W, px, C)
    bot = jnp.stack([o10, o11], axis=3)
    o = jnp.stack([top, bot], axis=3)              # (N, H, W, py, px, C)
    return o.transpose(0, 1, 3, 2, 4, 5).reshape(N, 2 * H, 2 * W, Cout)


# ----------------------------------------------------------------------------
# Parameter construction (deterministic synthetic weights, pre-laid-out for the MXU).
# Params contain ONLY arrays; all conv hyper-parameters are static Python in forward().
# ----------------------------------------------------------------------------
class KeyGen:
    def __init__(self, key):
        self.key = key

    def __call__(self):
        self.key, k = jax.random.split(self.key)
        return k


def _conv_w(kg, cout, cin, k):
    fan_in = cin * k * k
    w = jax.random.normal(kg(), (cout, cin, k, k), jnp.float32) * jnp.sqrt(2.0 / fan_in)
    # (ky, kx, cin, cout) row order to match _im2col column order.
    return jnp.transpose(w, (2, 3, 1, 0)).reshape(k * k * cin, cout).astype(jnp.bfloat16)


def _bn_p(c):
    return {"gamma": jnp.ones((c,), jnp.float32), "beta": jnp.zeros((c,), jnp.float32)}


def make_resnet50(kg, in_ch):
    params = {"conv1": _conv_w(kg, 64, in_ch, 7), "bn1": _bn_p(64), "layers": []}
    inplanes = 64
    for planes, nblocks, stride in _RESNET50_STAGES:
        blocks = []
        for b in range(nblocks):
            s = stride if b == 0 else 1
            outp = planes * 4
            blk = {"conv1": _conv_w(kg, planes, inplanes, 1), "bn1": _bn_p(planes),
                   "conv2": _conv_w(kg, planes, planes, 3), "bn2": _bn_p(planes),
                   "conv3": _conv_w(kg, outp, planes, 1), "bn3": _bn_p(outp)}
            if s != 1 or inplanes != outp:
                blk["ds_w"] = _conv_w(kg, outp, inplanes, 1)
                blk["ds_bn"] = _bn_p(outp)
            blocks.append(blk)
            inplanes = outp
        params["layers"].append(blocks)
    return params


def make_decoder(kg):
    chans = [(4096, 2048), (2048, 1024), (1024, 512), (512, 256), (256, 128)]
    layers = []
    for cin, cout in chans:
        w = (jax.random.normal(kg(), (cin, cout, 3, 3), jnp.float32)
             / jnp.sqrt(float(cin * 9)))
        b = jax.random.normal(kg(), (cout,), jnp.float32) * 0.01
        wb = w.astype(jnp.bfloat16)
        # Precomputed parity sub-kernels (PyTorch ConvTranspose2d weight layout
        # (Cin, Cout, ky, kx)); K rows ordered to match the activation concat order.
        layers.append({
            "w00": wb[:, :, 1, 1],
            "w01": jnp.concatenate([wb[:, :, 1, 2], wb[:, :, 1, 0]], axis=0),
            "w10": jnp.concatenate([wb[:, :, 2, 1], wb[:, :, 0, 1]], axis=0),
            "w11": jnp.concatenate([wb[:, :, 2, 2], wb[:, :, 2, 0],
                                    wb[:, :, 0, 2], wb[:, :, 0, 0]], axis=0),
            "b": b,
            "gn_gamma": jnp.ones((cout,), jnp.float32),
            "gn_beta": jnp.zeros((cout,), jnp.float32),
        })
    return layers


# ----------------------------------------------------------------------------
# Forward passes (all static structure; one outer jax.jit).
# ----------------------------------------------------------------------------
def _bottleneck_forward(x, p, stride):
    out = conv_bn_act(x, p["conv1"], p["bn1"], k=1, stride=1, pad=0, relu=True)
    out = conv_bn_act(out, p["conv2"], p["bn2"], k=3, stride=stride, pad=1, relu=True)
    if "ds_w" in p:
        sc = conv_bn_act(x, p["ds_w"], p["ds_bn"], k=1, stride=stride, pad=0, relu=False)
    else:
        sc = x
    return conv_bn_act(out, p["conv3"], p["bn3"], k=1, stride=1, pad=0, relu=True,
                       residual=sc)


def resnet_forward(x, params):
    x = conv_bn_act(x, params["conv1"], params["bn1"], k=7, stride=2, pad=3, relu=True)
    x = maxpool_3x3_s2_p1(x)
    for (planes, nblocks, stride), blocks in zip(_RESNET50_STAGES, params["layers"]):
        for bidx, p in enumerate(blocks):
            x = _bottleneck_forward(x, p, stride if bidx == 0 else 1)
    return x                                   # (N, H/32, W/32, 2048)


def decoder_forward(x, layers):
    n = len(layers)
    for idx, p in enumerate(layers):
        x = _deconv_s2(x, p)
        x = _groupnorm_act(x, p["gn_gamma"], p["gn_beta"], num_groups=16,
                           eps=GN_EPS, final_tanh=(idx == n - 1))
    return x


def custom_model_forward(satellite_nchw, structure_nchw, params):
    # I/O is NCHW (PyTorch convention); internal compute is channels-last bf16.
    # NOTE: BatchNorm uses batch statistics (module default training mode, no .eval()).
    sat = jnp.transpose(satellite_nchw, (0, 2, 3, 1)).astype(jnp.bfloat16)
    stc = jnp.transpose(structure_nchw, (0, 2, 3, 1)).astype(jnp.bfloat16)
    f_sat = resnet_forward(sat, params["satellite"])
    f_stc = resnet_forward(stc, params["structure"])
    combined = jnp.concatenate([f_sat, f_stc], axis=-1)    # == cat on dim=1 in NCHW
    out = decoder_forward(combined, params["decoder"])
    return jnp.transpose(out, (0, 3, 1, 2)).astype(jnp.float32)


# One jit around the whole forward: removes eager per-op dispatch between pallas_calls
# and lets XLA fuse the reshape / pad / concat / interleave glue.
custom_model_forward_jit = jax.jit(custom_model_forward)


if __name__ == "__main__":
    kg = KeyGen(jax.random.PRNGKey(0))
    params = {
        "satellite": make_resnet50(kg, 3),
        "structure": make_resnet50(kg, 1),
        "decoder": make_decoder(kg),
    }

    k1, k2 = jax.random.split(jax.random.PRNGKey(0))
    satellite_input = jax.random.normal(k1, (1, 3, 32, 32), jnp.float32)
    structure_input = jax.random.normal(k2, (1, 1, 32, 32), jnp.float32)

    out = custom_model_forward_jit(satellite_input, structure_input, params)
    out = jax.block_until_ready(out)
    assert out.shape == (1, 128, 32, 32), out.shape
    assert bool(jnp.all(jnp.isfinite(out)))
    print("KERNEL_OK")
</pallas_src>

<mosaic_0001>
module attributes {stable_mosaic.version = 11 : i64} {
  func.func @_conv_bn_kernel(%arg0: i32, %arg1: i32, %arg2: memref<256x147xbf16, #tpu.memory_space<vmem>>, %arg3: memref<147x128xbf16, #tpu.memory_space<vmem>>, %arg4: memref<1x128xf32, #tpu.memory_space<vmem>>, %arg5: memref<1x128xf32, #tpu.memory_space<vmem>>, %arg6: memref<256x128xbf16, #tpu.memory_space<vmem>>, %arg7: memref<256x128xf32, #tpu.memory_space<vmem>>) attributes {dimension_semantics = [#tpu.dimension_semantics<parallel>, #tpu.dimension_semantics<arbitrary>], iteration_bounds = array<i64: 1, 1>, scalar_prefetch = 0 : i64, scratch_operands = 1 : i64, tpu.core_type = #tpu.core_type<tc>, window_params = [{transform_indices = @transform_0, window_bounds = array<i64: 256, 147>}, {transform_indices = @transform_1, window_bounds = array<i64: 147, 128>}, {transform_indices = @transform_2, window_bounds = array<i64: 1, 128>}, {transform_indices = @transform_3, window_bounds = array<i64: 1, 128>}, {transform_indices = @transform_4, window_bounds = array<i64: 256, 128>}]} {
    %c0_i32 = arith.constant 0 : i32
    %0 = arith.cmpi eq, %arg1, %c0_i32 : i32
    %1 = arith.extui %0 : i1 to i32
    %c0_i32_0 = arith.constant 0 : i32
    %2 = arith.cmpi ne, %1, %c0_i32_0 : i32
    scf.if %2 {
      %cst_10 = arith.constant 0.000000e+00 : f32
      %12 = vector.broadcast %cst_10 : f32 to vector<256x128xf32>
      %c0_11 = arith.constant 0 : index
      %c0_12 = arith.constant 0 : index
      %13 = vector.load %arg7[%c0_11, %c0_12] : memref<256x128xf32, #tpu.memory_space<vmem>>, vector<256x128xf32>
      tpu.vector_store %arg7[%c0_11, %c0_12], %12 {strides = array<i32>} : memref<256x128xf32, #tpu.memory_space<vmem>>, vector<256x128xf32>,
    } else {
    }
    %c0 = arith.constant 0 : index
    %c0_1 = arith.constant 0 : index
    %3 = vector.load %arg7[%c0, %c0_1] : memref<256x128xf32, #tpu.memory_space<vmem>>, vector<256x128xf32>
    %c0_2 = arith.constant 0 : index
    %c0_3 = arith.constant 0 : index
    %4 = vector.load %arg2[%c0_2, %c0_3] : memref<256x147xbf16, #tpu.memory_space<vmem>>, vector<256x147xbf16>
    %c0_4 = arith.constant 0 : index
    %c0_5 = arith.constant 0 : index
    %5 = vector.load %arg3[%c0_4, %c0_5] : memref<147x128xbf16, #tpu.memory_space<vmem>>, vector<147x128xbf16>
    %cst = arith.constant dense<0.000000e+00> : vector<256x128xf32>
    %6 = tpu.matmul %4, %5, %cst {dimension_numbers = #tpu.dot_dimension_numbers<[1], [0], [0], [1], [0, 0, 1, 1], [], []>} : vector<256x147xbf16>, vector<147x128xbf16>, vector<256x128xf32> -> vector<256x128xf32>
    %7 = arith.addf %3, %6 : vector<256x128xf32>
    %c0_6 = arith.constant 0 : index
    %c0_7 = arith.constant 0 : index
    %8 = vector.load %arg7[%c0_6, %c0_7] : memref<256x128xf32, #tpu.memory_space<vmem>>, vector<256x128xf32>
    tpu.vector_store %arg7[%c0_6, %c0_7], %7 {strides = array<i32>} : memref<256x128xf32, #tpu.memory_space<vmem>>, vector<256x128xf32>,
    %c0_i32_8 = arith.constant 0 : i32
    %9 = arith.cmpi eq, %arg1, %c0_i32_8 : i32
    %10 = arith.extui %9 : i1 to i32
    %c0_i32_9 = arith.constant 0 : i32
    %11 = arith.cmpi ne, %10, %c0_i32_9 : i32
    scf.if %11 {
      %c0_10 = arith.constant 0 : index
      %c0_11 = arith.constant 0 : index
      %12 = vector.load %arg7[%c0_10, %c0_11] : memref<256x128xf32, #tpu.memory_space<vmem>>, vector<256x128xf32>
      %c0_12 = arith.constant 0 : index
      %c0_13 = arith.constant 0 : index
      %13 = vector.load %arg4[%c0_12, %c0_13] : memref<1x128xf32, #tpu.memory_space<vmem>>, vector<1x128xf32>
      %c0_14 = arith.constant 0 : index
      %c0_15 = arith.constant 0 : index
      %14 = vector.load %arg5[%c0_14, %c0_15] : memref<1x128xf32, #tpu.memory_space<vmem>>, vector<1x128xf32>
      %cst_16 = arith.constant dense<0.000000e+00> : vector<128xf32>
      %15 = vector.multi_reduction <add>, %12, %cst_16 [0] : vector<256x128xf32> to vector<128xf32>
      %16 = vector.shape_cast %15 : vector<128xf32> to vector<1x128xf32>
      %cst_17 = arith.constant 3.906250e-03 : f32
      %17 = vector.broadcast %cst_17 : f32 to vector<1x128xf32>
      %18 = arith.mulf %16, %17 : vector<1x128xf32>
      %19 = arith.mulf %12, %12 : vector<256x128xf32>
      %cst_18 = arith.constant dense<0.000000e+00> : vector<128xf32>
      %20 = vector.multi_reduction <add>, %19, %cst_18 [0] : vector<256x128xf32> to vector<128xf32>
      %21 = vector.shape_cast %20 : vector<128xf32> to vector<1x128xf32>
      %cst_19 = arith.constant 3.906250e-03 : f32
      %22 = vector.broadcast %cst_19 : f32 to vector<1x128xf32>
      %23 = arith.mulf %21, %22 : vector<1x128xf32>
      %24 = arith.mulf %18, %18 : vector<1x128xf32>
      %25 = arith.subf %23, %24 : vector<1x128xf32>
      %cst_20 = arith.constant 0.000000e+00 : f32
      %26 = vector.broadcast %cst_20 : f32 to vector<1x128xf32>
      %27 = arith.maximumf %25, %26 : vector<1x128xf32>
      %cst_21 = arith.constant 9.99999974E-6 : f32
      %28 = vector.broadcast %cst_21 : f32 to vector<1x128xf32>
      %29 = arith.addf %27, %28 : vector<1x128xf32>
      %30 = math.rsqrt %29 : vector<1x128xf32>
      %31 = arith.mulf %13, %30 : vector<1x128xf32>
      %32 = vector.broadcast %31 : vector<1x128xf32> to vector<256x128xf32>
      %33 = arith.mulf %12, %32 : vector<256x128xf32>
      %34 = arith.mulf %18, %31 : vector<1x128xf32>
      %35 = arith.subf %14, %34 : vector<1x128xf32>
      %36 = vector.broadcast %35 : vector<1x128xf32> to vector<256x128xf32>
      %37 = arith.addf %33, %36 : vector<256x128xf32>
      %cst_22 = arith.constant 0.000000e+00 : f32
      %38 = vector.broadcast %cst_22 : f32 to vector<256x128xf32>
      %39 = arith.maximumf %37, %38 : vector<256x128xf32>
      %40 = arith.truncf %39 : vector<256x128xf32> to vector<256x128xbf16>
      %c0_23 = arith.constant 0 : index
      %c0_24 = arith.constant 0 : index
      %41 = vector.load %arg6[%c0_23, %c0_24] : memref<256x128xbf16, #tpu.memory_space<vmem>>, vector<256x128xbf16>
      tpu.vector_store %arg6[%c0_23, %c0_24], %40 {strides = array<i32>} : memref<256x128xbf16, #tpu.memory_space<vmem>>, vector<256x128xbf16>,
    } else {
    }
    return
  }
  func.func @transform_0(%arg0: i32, %arg1: i32) -> (i32, i32) {
    %c0_i32 = arith.constant 0 : i32
    %c0_i32_0 = arith.constant 0 : i32
    return %c0_i32, %arg1 : i32, i32
  }
  func.func @transform_1(%arg0: i32, %arg1: i32) -> (i32, i32) {
    %c0_i32 = arith.constant 0 : i32
    return %arg1, %arg0 : i32, i32
  }
  func.func @transform_2(%arg0: i32, %arg1: i32) -> (i32, i32) {
    %c0_i32 = arith.constant 0 : i32
    %c0_i32_0 = arith.constant 0 : i32
    return %c0_i32, %arg0 : i32, i32
  }
  func.func @transform_3(%arg0: i32, %arg1: i32) -> (i32, i32) {
    %c0_i32 = arith.constant 0 : i32
    %c0_i32_0 = arith.constant 0 : i32
    return %c0_i32, %arg0 : i32, i32
  }
  func.func @transform_4(%arg0: i32, %arg1: i32) -> (i32, i32) {
    %c0_i32 = arith.constant 0 : i32
    %c0_i32_0 = arith.constant 0 : i32
    return %c0_i32, %arg0 : i32, i32
  }
}

</mosaic_0001>

<bundles_post_ra>
// kernel: _conv_gemm_bn.1
= control target key start
LH: loop header
LB: loop body
LE: loop exit
PB: predicated region body
PF: predicated region fallthrough
CT: control target
= control target key end

     0   :  { %v1343_v0 = vmov 0   ;;  %vm338_vm0 = vcmask 154624   ;;  %vm387_vm1 = vcmask 1040384   ;;  %vm388_vm2 = vcmask 1041408   ;;  %s1779_s1 = inlined_call_operand.vmem [shape: bf16[147,128], index: 1, kind: input, shape index: {}]   ;;  %s1780_s0 = inlined_call_operand.vmem [shape: bf16[256,147], index: 0, kind: input, shape index: {}]   ;;  %s1781_s2 = inlined_call_operand.vmem [shape: f32[1,128], index: 2, kind: input, shape index: {}]   ;;  %s1782_s3 = inlined_call_operand.vmem [shape: f32[1,128], index: 3, kind: input, shape index: {}]   ;;  %s1783_s4 = inlined_call_operand.vmem [shape: bf16[256,128], index: 4, kind: output, shape index: {}]  }
   0x1   :  { %394 = vmatprep.subr.bf16.mxu0 %v1343_v0  ;;  %v1283_v1 = vld [vmem:[%s1779_s1] sm:$0xff]   ;;  %1261 = vmatprep.subr.bf16.mxu1 %v1343_v0  ;;  %v1284_v2 = vld [vmem:[%s1779_s1 + $0x8] sm:$0xff]   ;;  %v1285_v3 = vld [vmem:[%s1779_s1 + $0x10] sm:$0xff]   ;;  %v1344_v11 = vmov 65535  }
   0x2   :  { %395 = vmatpush1.bf16.msra.mxu0 %v1283_v1  ;;  %1271 = vmatpush1.bf16.msra.mxu1 %v1283_v1  ;;  %v1286_v4 = vld [vmem:[%s1779_s1 + $0x18] sm:$0xff]   ;;  %v1295_v5 = vld [vmem:[%s1780_s0 + $0x4] ss:$8 sps:$4 sm:$0xff]   ;;  %v1289_v9 = vld [vmem:[%s1779_s1 + $0x30] sm:$0xff]   ;;  %v389_v12 = vsel %vm387_vm1, 4294967295, %v1344_v11 }
   0x3   :  { %396 = vmatprep.subr.bf16.mxu0 %v1343_v0  ;;  %1262 = vmatprep.subr.bf16.mxu1 %v1343_v0  ;;  %v1287_v6 = vld [vmem:[%s1779_s1 + $0x20] sm:$0xff]   ;;  %v1288_v8 = vld [vmem:[%s1779_s1 + $0x28] sm:$0xff]   ;;  %v1290_v10 = vld [vmem:[%s1779_s1 + $0x38] sm:$0xff]   ;;  %v390_v15 = vsel %vm388_vm2, %v389_v12, 0 }
   0x4   :  { %1086 = vmatprep.mubr.msk.bf16.mxu0 %vm338_vm0, %v1295_v5  ;;  %v1307_v7 = vld [vmem:[%s1780_s0 + $0x84] ss:$8 sps:$4 sm:$0xff]   ;;  %v1292_v14 = vld [vmem:[%s1779_s1 + $0x48] ss:$0 sps:$4 sm:$0x33]  }
   0x5   :  { %1094 = vmatprep.mubr.msk.bf16.mxu1 %vm338_vm0, %v1307_v7  ;;  %v1291_v13 = vld [vmem:[%s1779_s1 + $0x40] sm:$0xff]   ;;  %v392_v16 = vand.u32 %v1292_v14, %v390_v15  ;;  %v1296_v19 = vld [vmem:[%s1780_s0 + $0x14] ss:$8 sps:$4 sm:$0xff]   ;;  %v1298_v21 = vld [vmem:[%s1780_s0 + $0x10] ss:$8 sps:$4 sm:$0xff]  }
   0x6   :  { %397 = vmatpush1.bf16.msra.mxu0 %v1284_v2  ;;  %1272 = vmatpush1.bf16.msra.mxu1 %v1284_v2  ;;  %v1293_v17 = vld [vmem:[%s1780_s0] ss:$8 sps:$4 sm:$0xff]   ;;  %v1311_v20 = vld [vmem:[%s1780_s0 + $0x94] ss:$8 sps:$4 sm:$0xff]   ;;  %v1313_v22 = vld [vmem:[%s1780_s0 + $0x90] ss:$8 sps:$4 sm:$0xff]  }
   0x7   :  { %398 = vmatprep.subr.bf16.mxu0 %v1343_v0  ;;  %1263 = vmatprep.subr.bf16.mxu1 %v1343_v0  ;;  %v1305_v18 = vld [vmem:[%s1780_s0 + $0x80] ss:$8 sps:$4 sm:$0xff]   ;;  %v1299_v23 = vld [vmem:[%s1780_s0 + $0x24] ss:$8 sps:$4 sm:$0xff]   ;;  %v1302_v27 = vld [vmem:[%s1780_s0 + $0x34] ss:$8 sps:$4 sm:$0xff]  }
   0x8   :  { %v1317_v24 = vld [vmem:[%s1780_s0 + $0xa4] ss:$8 sps:$4 sm:$0xff]   ;;  %v1301_v25 = vld [vmem:[%s1780_s0 + $0x20] ss:$8 sps:$4 sm:$0xff]   ;;  %v1323_v28 = vld [vmem:[%s1780_s0 + $0xb4] ss:$8 sps:$4 sm:$0xff]  }
   0x9   :  { %v1319_v26 = vld [vmem:[%s1780_s0 + $0xa0] ss:$8 sps:$4 sm:$0xff]   ;;  %v1304_v29 = vld [vmem:[%s1780_s0 + $0x30] ss:$8 sps:$4 sm:$0xff]   ;;  %v1308_v31 = vld [vmem:[%s1780_s0 + $0x44] ss:$8 sps:$4 sm:$0xff]  }
   0xa   :  { %399 = vmatpush1.bf16.msra.mxu0 %v1285_v3  ;;  %1273 = vmatpush1.bf16.msra.mxu1 %v1285_v3  ;;  %v1325_v30 = vld [vmem:[%s1780_s0 + $0xb0] ss:$8 sps:$4 sm:$0xff]   ;;  %v1329_v32 = vld [vmem:[%s1780_s0 + $0xc4] ss:$8 sps:$4 sm:$0xff]   ;;  %v1310_v33 = vld [vmem:[%s1780_s0 + $0x40] ss:$8 sps:$4 sm:$0xff]  }
   0xb   :  { %400 = vmatprep.subr.bf16.mxu0 %v1343_v0  ;;  %1264 = vmatprep.subr.bf16.mxu1 %v1343_v0  ;;  %v1331_v34 = vld [vmem:[%s1780_s0 + $0xc0] ss:$8 sps:$4 sm:$0xff]   ;;  %v1314_v35 = vld [vmem:[%s1780_s0 + $0x54] ss:$8 sps:$4 sm:$0xff]   ;;  %v1316_v37 = vld [vmem:[%s1780_s0 + $0x50] ss:$8 sps:$4 sm:$0xff]  }
   0xc   :  { %v1332_v36 = vld [vmem:[%s1780_s0 + $0xd4] ss:$8 sps:$4 sm:$0xff]   ;;  %v1334_v38 = vld [vmem:[%s1780_s0 + $0xd0] ss:$8 sps:$4 sm:$0xff]   ;;  %v1320_v39 = vld [vmem:[%s1780_s0 + $0x64] ss:$8 sps:$4 sm:$0xff]  }
   0xd   :  { %v1335_v40 = vld [vmem:[%s1780_s0 + $0xe4] ss:$8 sps:$4 sm:$0xff]   ;;  %v1322_v41 = vld [vmem:[%s1780_s0 + $0x60] ss:$8 sps:$4 sm:$0xff]   ;;  %v1326_v43 = vld [vmem:[%s1780_s0 + $0x74] ss:$8 sps:$4 sm:$0xff]  }
   0xe   :  { %401 = vmatpush1.bf16.msra.mxu0 %v1286_v4  ;;  %1274 = vmatpush1.bf16.msra.mxu1 %v1286_v4  ;;  %v1337_v42 = vld [vmem:[%s1780_s0 + $0xe0] ss:$8 sps:$4 sm:$0xff]   ;;  %v1338_v44 = vld [vmem:[%s1780_s0 + $0xf4] ss:$8 sps:$4 sm:$0xff]   ;;  %v1328_v45 = vld [vmem:[%s1780_s0 + $0x70] ss:$8 sps:$4 sm:$0xff]  }
   0xf   :  { %402 = vmatprep.subr.bf16.mxu0 %v1343_v0  ;;  %1265 = vmatprep.subr.bf16.mxu1 %v1343_v0  ;;  %v1340_v46 = vld [vmem:[%s1780_s0 + $0xf0] ss:$8 sps:$4 sm:$0xff]  }
  0x12   :  { %403 = vmatpush1.bf16.msra.mxu0 %v1287_v6  ;;  %1275 = vmatpush1.bf16.msra.mxu1 %v1287_v6 }
  0x13   :  { %404 = vmatprep.subr.bf16.mxu0 %v1343_v0  ;;  %1266 = vmatprep.subr.bf16.mxu1 %v1343_v0 }
  0x16   :  { %405 = vmatpush1.bf16.msra.mxu0 %v1288_v8  ;;  %1276 = vmatpush1.bf16.msra.mxu1 %v1288_v8 }
  0x17   :  { %406 = vmatprep.subr.bf16.mxu0 %v1343_v0  ;;  %1267 = vmatprep.subr.bf16.mxu1 %v1343_v0 }
  0x1a   :  { %407 = vmatpush1.bf16.msra.mxu0 %v1289_v9  ;;  %1277 = vmatpush1.bf16.msra.mxu1 %v1289_v9 }
  0x1b   :  { %408 = vmatprep.subr.bf16.mxu0 %v1343_v0  ;;  %1268 = vmatprep.subr.bf16.mxu1 %v1343_v0 }
  0x1e   :  { %409 = vmatpush1.bf16.msra.mxu0 %v1290_v10  ;;  %1278 = vmatpush1.bf16.msra.mxu1 %v1290_v10 }
  0x1f   :  { %410 = vmatprep.subr.bf16.mxu0 %v1343_v0  ;;  %1269 = vmatprep.subr.bf16.mxu1 %v1343_v0 }
  0x22   :  { %411 = vmatpush1.bf16.msra.mxu0 %v1291_v13  ;;  %1279 = vmatpush1.bf16.msra.mxu1 %v1291_v13 }
  0x23   :  { %412 = vmatprep.subr.bf16.mxu0 %v1343_v0  ;;  %1270 = vmatprep.subr.bf16.mxu1 %v1343_v0 }
  0x26   :  { %413 = vmatpush1.bf16.msra.mxu0 %v392_v16  ;;  %1280 = vmatpush1.bf16.msra.mxu1 %v392_v16 }
  0x29   :  { %427 = vmatmul.mubr.bf16.vlgmr.msra.gmra.mrb[0].mxu0 %v1293_v17  ;;  %491 = vmatmul.mubr.bf16.vlgmr.msra.gmra.mrb[0].mxu1 %v1305_v18 }
  0x2a   :  { %1087 = vmatprep.mubr.msk.bf16.mxu0 %vm338_vm0, %v1296_v19  ;;  %1095 = vmatprep.mubr.msk.bf16.mxu1 %vm338_vm0, %v1311_v20 }
  0x31   :  { %435 = vmatmul.mubr.bf16.gmra.mrb[4].mxu0 %v1298_v21  ;;  %499 = vmatmul.mubr.bf16.gmra.mrb[4].mxu1 %v1313_v22 }
  0x32   :  { %1088 = vmatprep.mubr.msk.bf16.mxu0 %vm338_vm0, %v1299_v23  ;;  %1096 = vmatprep.mubr.msk.bf16.mxu1 %vm338_vm0, %v1317_v24 }
  0x39   :  { %443 = vmatmul.mubr.bf16.gmra.mrb[8].mxu0 %v1301_v25  ;;  %507 = vmatmul.mubr.bf16.gmra.mrb[8].mxu1 %v1319_v26 }
  0x3a   :  { %1089 = vmatprep.mubr.msk.bf16.mxu0 %vm338_vm0, %v1302_v27  ;;  %1097 = vmatprep.mubr.msk.bf16.mxu1 %vm338_vm0, %v1323_v28 }
  0x41   :  { %451 = vmatmul.mubr.bf16.gmra.mrb[12].mxu0 %v1304_v29  ;;  %515 = vmatmul.mubr.bf16.gmra.mrb[12].mxu1 %v1325_v30 }
  0x42   :  { %1090 = vmatprep.mubr.msk.bf16.mxu0 %vm338_vm0, %v1308_v31  ;;  %1098 = vmatprep.mubr.msk.bf16.mxu1 %vm338_vm0, %v1329_v32 }
  0x49   :  { %459 = vmatmul.mubr.bf16.gmra.mrb[16].mxu0 %v1310_v33  ;;  %523 = vmatmul.mubr.bf16.gmra.mrb[16].mxu1 %v1331_v34 }
  0x4a   :  { %1091 = vmatprep.mubr.msk.bf16.mxu0 %vm338_vm0, %v1314_v35  ;;  %1099 = vmatprep.mubr.msk.bf16.mxu1 %vm338_vm0, %v1332_v36 }
  0x51   :  { %467 = vmatmul.mubr.bf16.gmra.mrb[20].mxu0 %v1316_v37  ;;  %531 = vmatmul.mubr.bf16.gmra.mrb[20].mxu1 %v1334_v38 }
  0x52   :  { %1092 = vmatprep.mubr.msk.bf16.mxu0 %vm338_vm0, %v1320_v39  ;;  %1100 = vmatprep.mubr.msk.bf16.mxu1 %vm338_vm0, %v1335_v40 }
  0x59   :  { %475 = vmatmul.mubr.bf16.gmra.mrb[24].mxu0 %v1322_v41  ;;  %539 = vmatmul.mubr.bf16.gmra.mrb[24].mxu1 %v1337_v42 }
  0x5a   :  { %1093 = vmatprep.mubr.msk.bf16.mxu0 %vm338_vm0, %v1326_v43  ;;  %1101 = vmatprep.mubr.msk.bf16.mxu1 %vm338_vm0, %v1338_v44 }
  0x61   :  { %483 = vmatmul.mubr.bf16.gmra.mrb[28].mxu0 %v1328_v45  ;;  %547 = vmatmul.mubr.bf16.gmra.mrb[28].mxu1 %v1340_v46 }
  0xfc   :  { %v1512_v47 = vpop.f32.mrb[0].mxu0  ;;  %v1514_v48 = vpop.f32.mrb[0].mxu1 }
  0xfd   :  { %v430_v49 = vpop.f32.mrb[1].mxu0  ;;  %v494_v50 = vpop.f32.mrb[1].mxu1  ;;  %v694_v53 = vmul.f32 %v1512_v47, %v1512_v47 }
  0xfe   :  { %v1516_v51 = vpop.f32.mrb[2].mxu0  ;;  %v1518_v52 = vpop.f32.mrb[2].mxu1 }
  0xff   :  { %v656_v54 = vadd.f32 %v1516_v51, %v1512_v47  ;;  %v695_v55 = vmul.f32 %v1516_v51, %v1516_v51  ;;  %v433_v56 = vpop.f32.mrb[3].mxu0  ;;  %v497_v57 = vpop.f32.mrb[3].mxu1 }
 0x101   :  { %v726_v58 = vadd.f32 %v695_v55, %v694_v53 }
 0x104   :  { %v1526_v59 = vpop.f32.mrb[4].mxu0  ;;  %v1528_v60 = vpop.f32.mrb[4].mxu1 }
 0x105   :  { %v657_v61 = vadd.f32 %v656_v54, %v1526_v59  ;;  %v696_v62 = vmul.f32 %v1526_v59, %v1526_v59  ;;  %v438_v63 = vpop.f32.mrb[5].mxu0  ;;  %v502_v0 = vpop.f32.mrb[5].mxu1 }
 0x106   :  { %v1533_v1 = vpop.f32.mrb[6].mxu0  ;;  %v1535_v2 = vpop.f32.mrb[6].mxu1 }
 0x107   :  { %v727_v3 = vadd.f32 %v726_v58, %v696_v62  ;;  %v658_v4 = vadd.f32 %v657_v61, %v1533_v1  ;;  %v697_v5 = vmul.f32 %v1533_v1, %v1533_v1  ;;  %v441_v6 = vpop.f32.mrb[7].mxu0  ;;  %v505_v7 = vpop.f32.mrb[7].mxu1 }
 0x109   :  { %v728_v8 = vadd.f32 %v727_v3, %v697_v5 }
 0x10c   :  { %v1540_v9 = vpop.f32.mrb[8].mxu0  ;;  %v1542_v10 = vpop.f32.mrb[8].mxu1 }
 0x10d   :  { %v659_v11 = vadd.f32 %v658_v4, %v1540_v9  ;;  %v698_v12 = vmul.f32 %v1540_v9, %v1540_v9  ;;  %v446_v13 = vpop.f32.mrb[9].mxu0  ;;  %v510_v14 = vpop.f32.mrb[9].mxu1 }
 0x10e   :  { %v1547_v15 = vpop.f32.mrb[10].mxu0  ;;  %v1549_v16 = vpop.f32.mrb[10].mxu1 }
 0x10f   :  { %v729_v17 = vadd.f32 %v728_v8, %v698_v12  ;;  %v660_v18 = vadd.f32 %v659_v11, %v1547_v15  ;;  %v699_v19 = vmul.f32 %v1547_v15, %v1547_v15  ;;  %v449_v20 = vpop.f32.mrb[11].mxu0  ;;  %v513_v21 = vpop.f32.mrb[11].mxu1 }
 0x111   :  { %v730_v22 = vadd.f32 %v729_v17, %v699_v19 }
 0x114   :  { %v1554_v23 = vpop.f32.mrb[12].mxu0  ;;  %v1556_v24 = vpop.f32.mrb[12].mxu1 }
 0x115   :  { %v661_v25 = vadd.f32 %v660_v18, %v1554_v23  ;;  %v700_v26 = vmul.f32 %v1554_v23, %v1554_v23  ;;  %v454_v27 = vpop.f32.mrb[13].mxu0  ;;  %v518_v28 = vpop.f32.mrb[13].mxu1 }
 0x116   :  { %v1561_v29 = vpop.f32.mrb[14].mxu0  ;;  %v1563_v30 = vpop.f32.mrb[14].mxu1 }
 0x117   :  { %v731_v31 = vadd.f32 %v730_v22, %v700_v26  ;;  %v662_v32 = vadd.f32 %v661_v25, %v1561_v29  ;;  %v701_v33 = vmul.f32 %v1561_v29, %v1561_v29  ;;  %v457_v34 = vpop.f32.mrb[15].mxu0  ;;  %v521_v35 = vpop.f32.mrb[15].mxu1 }
 0x119   :  { %v732_v36 = vadd.f32 %v731_v31, %v701_v33 }
 0x11c   :  { %v1568_v37 = vpop.f32.mrb[16].mxu0  ;;  %v1570_v38 = vpop.f32.mrb[16].mxu1 }
 0x11d   :  { %v663_v39 = vadd.f32 %v662_v32, %v1568_v37  ;;  %v702_v40 = vmul.f32 %v1568_v37, %v1568_v37  ;;  %v462_v41 = vpop.f32.mrb[17].mxu0  ;;  %v526_v42 = vpop.f32.mrb[17].mxu1 }
 0x11e   :  { %v1575_v43 = vpop.f32.mrb[18].mxu0  ;;  %v1577_v44 = vpop.f32.mrb[18].mxu1 }
 0x11f   :  { %v733_v45 = vadd.f32 %v732_v36, %v702_v40  ;;  %v664_v46 = vadd.f32 %v663_v39, %v1575_v43  ;;  %v703_v49 = vmul.f32 %v1575_v43, %v1575_v43  ;;  %v465_v50 = vpop.f32.mrb[19].mxu0  ;;  %v529_v53 = vpop.f32.mrb[19].mxu1 }
 0x120   :  { %v710_v50 = vmul.f32 %v1514_v48, %v1514_v48 }
 0x121   :  { %v734_v54 = vadd.f32 %v733_v45, %v703_v49 }
 0x124   :  { %v1582_v55 = vpop.f32.mrb[20].mxu0  ;;  %v1584_v56 = vpop.f32.mrb[20].mxu1 }
 0x125   :  { %v665_v57 = vadd.f32 %v664_v46, %v1582_v55  ;;  %v704_v58 = vmul.f32 %v1582_v55, %v1582_v55  ;;  %v470_v61 = vpop.f32.mrb[21].mxu0  ;;  %v534_v62 = vpop.f32.mrb[21].mxu1 }
 0x126   :  { %v1589_v63 = vpop.f32.mrb[22].mxu0  ;;  %v1591_v0 = vpop.f32.mrb[22].mxu1  ;;  %v712_v62 = vmul.f32 %v1528_v60, %v1528_v60 }
 0x127   :  { %v735_v3 = vadd.f32 %v734_v54, %v704_v58  ;;  %v666_v4 = vadd.f32 %v665_v57, %v1589_v63  ;;  %v705_v5 = vmul.f32 %v1589_v63, %v1589_v63  ;;  %v473_v6 = vpop.f32.mrb[23].mxu0  ;;  %v537_v7 = vpop.f32.mrb[23].mxu1  ;;  %v711_v57 = vmul.f32 %v1518_v52, %v1518_v52 }
 0x129   :  { %v736_v8 = vadd.f32 %v735_v3, %v705_v5  ;;  %v713_v5 = vmul.f32 %v1535_v2, %v1535_v2 }
 0x12c   :  { %v1596_v11 = vpop.f32.mrb[24].mxu0  ;;  %v1598_v12 = vpop.f32.mrb[24].mxu1 }
 0x12d   :  { %v667_v13 = vadd.f32 %v666_v4, %v1596_v11  ;;  %v706_v14 = vmul.f32 %v1596_v11, %v1596_v11  ;;  %v478_v17 = vpop.f32.mrb[25].mxu0  ;;  %v542_v18 = vpop.f32.mrb[25].mxu1 }
 0x12e   :  { %v1603_v19 = vpop.f32.mrb[26].mxu0  ;;  %v1605_v20 = vpop.f32.mrb[26].mxu1  ;;  %v715_v17 = vmul.f32 %v1549_v16, %v1549_v16 }
 0x12f   :  { %v737_v21 = vadd.f32 %v736_v8, %v706_v14  ;;  %v668_v22 = vadd.f32 %v667_v13, %v1603_v19  ;;  %v707_v25 = vmul.f32 %v1603_v19, %v1603_v19  ;;  %v481_v26 = vpop.f32.mrb[27].mxu0  ;;  %v545_v27 = vpop.f32.mrb[27].mxu1  ;;  %v714_v8 = vmul.f32 %v1542_v10, %v1542_v10 }
 0x130   :  { %v717_v27 = vmul.f32 %v1563_v30, %v1563_v30 }
 0x131   :  { %v738_v28 = vadd.f32 %v737_v21, %v707_v25 }
 0x134   :  { %v1610_v31 = vpop.f32.mrb[28].mxu0  ;;  %v1612_v32 = vpop.f32.mrb[28].mxu1 }
 0x135   :  { %v669_v33 = vadd.f32 %v668_v22, %v1610_v31  ;;  %v708_v34 = vmul.f32 %v1610_v31, %v1610_v31  ;;  %v486_v35 = vpop.f32.mrb[29].mxu0  ;;  %v550_v36 = vpop.f32.mrb[29].mxu1  ;;  %v716_v22 = vmul.f32 %v1556_v24, %v1556_v24 }
 0x136   :  { %v1617_v39 = vpop.f32.mrb[30].mxu0  ;;  %v1619_v40 = vpop.f32.mrb[30].mxu1  ;;  %v718_v35 = vmul.f32 %v1570_v38, %v1570_v38 }
 0x137   :  { %v739_v41 = vadd.f32 %v738_v28, %v708_v34  ;;  %v670_v42 = vadd.f32 %v669_v33, %v1617_v39  ;;  %v709_v45 = vmul.f32 %v1617_v39, %v1617_v39  ;;  %v489_v46 = vpop.f32.mrb[31].mxu0  ;;  %v553_v49 = vpop.f32.mrb[31].mxu1 }
 0x139   :  { %v671_v53 = vadd.f32 %v670_v42, %v1514_v48  ;;  %v740_v54 = vadd.f32 %v739_v41, %v709_v45  ;;  %v719_v45 = vmul.f32 %v1577_v44, %v1577_v44 }
 0x13b   :  { %v672_v58 = vadd.f32 %v671_v53, %v1518_v52  ;;  %v741_v61 = vadd.f32 %v740_v54, %v710_v50  ;;  %v720_v50 = vmul.f32 %v1584_v56, %v1584_v56 }
 0x13d   :  { %v673_v3 = vadd.f32 %v672_v58, %v1528_v60  ;;  %v742_v4 = vadd.f32 %v741_v61, %v711_v57  ;;  %v721_v57 = vmul.f32 %v1591_v0, %v1591_v0 }
 0x13f   :  { %v674_v6 = vadd.f32 %v673_v3, %v1535_v2  ;;  %v743_v7 = vadd.f32 %v742_v4, %v712_v62  ;;  %v722_v62 = vmul.f32 %v1598_v12, %v1598_v12 }
 0x141   :  { %v744_v13 = vadd.f32 %v743_v7, %v713_v5  ;;  %v675_v14 = vadd.f32 %v674_v6, %v1542_v10  ;;  %v723_v5 = vmul.f32 %v1605_v20, %v1605_v20  ;;  %v724_v6 = vmul.f32 %v1612_v32, %v1612_v32 }
 0x143   :  { %v676_v18 = vadd.f32 %v675_v14, %v1549_v16  ;;  %v745_v21 = vadd.f32 %v744_v13, %v714_v8 }
 0x145   :  { %v677_v25 = vadd.f32 %v676_v18, %v1556_v24  ;;  %v746_v26 = vadd.f32 %v745_v21, %v715_v17  ;;  %v725_v17 = vmul.f32 %v1619_v40, %v1619_v40 }
 0x147   :  { %v678_v28 = vadd.f32 %v677_v25, %v1563_v30  ;;  %v747_v33 = vadd.f32 %v746_v26, %v716_v22 }
 0x149   :  { %v679_v34 = vadd.f32 %v678_v28, %v1570_v38  ;;  %v748_v36 = vadd.f32 %v747_v33, %v717_v27 }
 0x14b   :  { %v749_v41 = vadd.f32 %v748_v36, %v718_v35  ;;  %v680_v42 = vadd.f32 %v679_v34, %v1577_v44 }
 0x14d   :  { %v750_v46 = vadd.f32 %v749_v41, %v719_v45  ;;  %v681_v49 = vadd.f32 %v680_v42, %v1584_v56 }
 0x14f   :  { %v751_v53 = vadd.f32 %v750_v46, %v720_v50  ;;  %v682_v54 = vadd.f32 %v681_v49, %v1591_v0 }
 0x151   :  { %v752_v58 = vadd.f32 %v751_v53, %v721_v57  ;;  %v683_v61 = vadd.f32 %v682_v54, %v1598_v12  ;;  %v771_v57 = vlaneseq }
 0x153   :  { %v753_v3 = vadd.f32 %v752_v58, %v722_v62  ;;  %v684_v4 = vadd.f32 %v683_v61, %v1605_v20  ;;  %v772_v58 = vshrl.u32 %v771_v57, 7  ;;  %v654_v61 = vld [vmem:[%s1781_s2] sm:$0x1] }
 0x155   :  { %v754_v7 = vadd.f32 %v753_v3, %v723_v5  ;;  %v685_v8 = vadd.f32 %v684_v4, %v1612_v32  ;;  %v773_v62 = vsub.s32 0, %v772_v58 }
 0x157   :  { %v755_v13 = vadd.f32 %v754_v7, %v724_v6  ;;  %v686_v14 = vadd.f32 %v685_v8, %v1619_v40 }
 0x159   :  { %v687_v18 = vrot.slane %v686_v14, 4  ;;  %v756_v21 = vadd.f32 %v755_v13, %v725_v17 }
 0x15b   :  { %v688_v22 = vadd.f32 %v687_v18, %v686_v14  ;;  %v757_v25 = vrot.slane %v756_v21, 4 }
 0x15d   :  { %v689_v26 = vrot.slane %v688_v22, 2  ;;  %v758_v27 = vadd.f32 %v757_v25, %v756_v21 }
 0x15f   :  { %v690_v28 = vadd.f32 %v689_v26, %v688_v22  ;;  %v759_v33 = vrot.slane %v758_v27, 2 }
 0x161   :  { %v691_v34 = vrot.slane %v690_v28, 1  ;;  %v760_v35 = vadd.f32 %v759_v33, %v758_v27 }
 0x163   :  { %v692_v36 = vadd.f32 %v691_v34, %v690_v28  ;;  %v761_v41 = vrot.slane %v760_v35, 1 }
 0x165   :  { %v693_v42 = vmul.f32 0.00390625, %v692_v36  ;;  %v762_v45 = vadd.f32 %v761_v41, %v760_v35 }
 0x167   :  { %v763_v46 = vmul.f32 0.00390625, %v762_v45  ;;  %v764_v49 = vmul.f32 %v693_v42, %v693_v42 }
 0x169   :  { %v765_v50 = vsub.f32 %v763_v46, %v764_v49 }
 0x16b   :  { %v766_v53 = vmax.f32 %v765_v50, 0.0 }
 0x16d   :  { %v767_v54 = vadd.f32 1e-05, %v766_v53 }
 0x16f   :  { %1341 = vrsqrt.f32 %v767_v54 }
 0x179   :  { %v1342_v3 = vpop.eup %1341 }
 0x17a   :  { %v769_v4 = vmul.f32 %v1342_v3, %v654_v61 }
 0x17c   :  { %v774_v5 = vrot.slane %v769_v4, %v773_v62  ;;  %v808_v6 = vmul.f32 %v769_v4, %v693_v42 }
 0x17e   :  { %v776_v7 = vmul.f32 %v774_v5, %v1512_v47  ;;  %v777_v8 = vmul.f32 %v774_v5, %v1516_v51  ;;  %v778_v13 = vmul.f32 %v774_v5, %v1526_v59  ;;  %v779_v14 = vmul.f32 %v774_v5, %v1533_v1 }
 0x17f   :  { %v780_v17 = vmul.f32 %v774_v5, %v1540_v9  ;;  %v781_v18 = vmul.f32 %v774_v5, %v1547_v15  ;;  %v782_v21 = vmul.f32 %v774_v5, %v1554_v23  ;;  %v783_v22 = vmul.f32 %v774_v5, %v1561_v29 }
 0x180   :  { %v784_v25 = vmul.f32 %v774_v5, %v1568_v37  ;;  %v785_v26 = vmul.f32 %v774_v5, %v1575_v43  ;;  %v786_v47 = vmul.f32 %v774_v5, %v1582_v55  ;;  %v787_v51 = vmul.f32 %v774_v5, %v1589_v63  ;;  %v655_v55 = vld [vmem:[%s1782_s3] sm:$0x1] }
 0x181   :  { %v788_v59 = vmul.f32 %v774_v5, %v1596_v11  ;;  %v789_v1 = vmul.f32 %v774_v5, %v1603_v19  ;;  %v790_v9 = vmul.f32 %v774_v5, %v1610_v31  ;;  %v791_v15 = vmul.f32 %v774_v5, %v1617_v39 }
 0x182   :  { %v792_v23 = vmul.f32 %v774_v5, %v1514_v48  ;;  %v793_v29 = vmul.f32 %v774_v5, %v1518_v52  ;;  %v794_v37 = vmul.f32 %v774_v5, %v1528_v60  ;;  %v795_v43 = vmul.f32 %v774_v5, %v1535_v2 }
 0x183   :  { %v796_v63 = vmul.f32 %v774_v5, %v1542_v10  ;;  %v797_v11 = vmul.f32 %v774_v5, %v1549_v16  ;;  %v798_v19 = vmul.f32 %v774_v5, %v1556_v24  ;;  %v799_v31 = vmul.f32 %v774_v5, %v1563_v30 }
 0x184   :  { %v800_v48 = vmul.f32 %v774_v5, %v1570_v38  ;;  %v801_v52 = vmul.f32 %v774_v5, %v1577_v44  ;;  %v802_v60 = vmul.f32 %v774_v5, %v1584_v56  ;;  %v803_v2 = vmul.f32 %v774_v5, %v1591_v0 }
 0x185   :  { %v804_v39 = vmul.f32 %v774_v5, %v1598_v12  ;;  %v805_v27 = vmul.f32 %v774_v5, %v1605_v20  ;;  %v806_v10 = vmul.f32 %v774_v5, %v1612_v32  ;;  %v807_v16 = vmul.f32 %v774_v5, %v1619_v40 }
 0x186   :  { %v809_v28 = vsub.f32 %v655_v55, %v808_v6 }
 0x188   :  { %v814_v24 = vrot.slane %v809_v28, %v773_v62 }
 0x18a   :  { %v1710_v33 = vadd.f32 %v814_v24, %v776_v7  ;;  %v1712_v30 = vadd.f32 %v814_v24, %v777_v8  ;;  %v1714_v38 = vadd.f32 %v814_v24, %v778_v13  ;;  %v1716_v44 = vadd.f32 %v814_v24, %v779_v14 }
 0x18b   :  { %v1718_v56 = vadd.f32 %v814_v24, %v780_v17  ;;  %v1720_v0 = vadd.f32 %v814_v24, %v781_v18  ;;  %v1722_v12 = vadd.f32 %v814_v24, %v782_v21  ;;  %v823_v20 = vadd.f32 %v814_v24, %v783_v22 }
 0x18c   :  { %v824_v32 = vadd.f32 %v814_v24, %v784_v25  ;;  %v825_v34 = vadd.f32 %v814_v24, %v785_v26  ;;  %v826_v40 = vadd.f32 %v814_v24, %v786_v47  ;;  %v827_v35 = vadd.f32 %v814_v24, %v787_v51 }
 0x18d   :  { %v828_v36 = vadd.f32 %v814_v24, %v788_v59  ;;  %v829_v41 = vadd.f32 %v814_v24, %v789_v1  ;;  %v830_v42 = vadd.f32 %v814_v24, %v790_v9  ;;  %v831_v45 = vadd.f32 %v814_v24, %v791_v15 }
 0x18e   :  { %v832_v46 = vadd.f32 %v814_v24, %v792_v23  ;;  %v833_v49 = vadd.f32 %v814_v24, %v793_v29  ;;  %v834_v50 = vadd.f32 %v814_v24, %v794_v37  ;;  %v835_v53 = vadd.f32 %v814_v24, %v795_v43 }
 0x18f   :  { %v836_v54 = vadd.f32 %v814_v24, %v796_v63  ;;  %v837_v57 = vadd.f32 %v814_v24, %v797_v11  ;;  %v838_v58 = vadd.f32 %v814_v24, %v798_v19  ;;  %v839_v61 = vadd.f32 %v814_v24, %v799_v31 }
 0x190   :  { %v840_v62 = vadd.f32 %v814_v24, %v800_v48  ;;  %v841_v3 = vadd.f32 %v814_v24, %v801_v52  ;;  %v842_v4 = vadd.f32 %v814_v24, %v802_v60  ;;  %v843_v5 = vadd.f32 %v814_v24, %v803_v2 }
 0x191   :  { %v844_v6 = vadd.f32 %v814_v24, %v804_v39  ;;  %v845_v7 = vadd.f32 %v814_v24, %v805_v27  ;;  %v846_v8 = vadd.f32 %v814_v24, %v806_v10  ;;  %v847_v13 = vadd.f32 %v814_v24, %v807_v16 }
 0x192   :  { %v848_v14 = vmax.f32 %v1710_v33, 0.0  ;;  %v849_v17 = vmax.f32 %v1712_v30, 0.0  ;;  %v850_v18 = vmax.f32 %v1714_v38, 0.0  ;;  %v851_v21 = vmax.f32 %v1716_v44, 0.0 }
 0x193   :  { %v852_v22 = vmax.f32 %v1718_v56, 0.0  ;;  %v853_v25 = vmax.f32 %v1720_v0, 0.0  ;;  %v854_v26 = vmax.f32 %v1722_v12, 0.0  ;;  %v855_v47 = vmax.f32 %v823_v20, 0.0 }
 0x194   :  { %v856_v51 = vmax.f32 %v824_v32, 0.0  ;;  %v857_v59 = vmax.f32 %v825_v34, 0.0  ;;  %v858_v1 = vmax.f32 %v826_v40, 0.0  ;;  %v859_v9 = vmax.f32 %v827_v35, 0.0 }
 0x195   :  { %v860_v15 = vmax.f32 %v828_v36, 0.0  ;;  %v861_v23 = vmax.f32 %v829_v41, 0.0  ;;  %v862_v29 = vmax.f32 %v830_v42, 0.0  ;;  %v863_v37 = vmax.f32 %v831_v45, 0.0 }
 0x196   :  { %v864_v43 = vmax.f32 %v832_v46, 0.0  ;;  %v865_v55 = vmax.f32 %v833_v49, 0.0  ;;  %v866_v63 = vmax.f32 %v834_v50, 0.0  ;;  %v867_v11 = vmax.f32 %v835_v53, 0.0 }
 0x197   :  { %v868_v19 = vmax.f32 %v836_v54, 0.0  ;;  %v869_v31 = vmax.f32 %v837_v57, 0.0  ;;  %v870_v48 = vmax.f32 %v838_v58, 0.0  ;;  %v871_v52 = vmax.f32 %v839_v61, 0.0 }
 0x198   :  { %v872_v60 = vmax.f32 %v840_v62, 0.0  ;;  %v873_v2 = vmax.f32 %v841_v3, 0.0  ;;  %v874_v39 = vmax.f32 %v842_v4, 0.0  ;;  %v875_v27 = vmax.f32 %v843_v5, 0.0 }
 0x199   :  { %v876_v10 = vmax.f32 %v844_v6, 0.0  ;;  %v877_v16 = vmax.f32 %v845_v7, 0.0  ;;  %v878_v28 = vmax.f32 %v846_v8, 0.0  ;;  %v879_v24 = vmax.f32 %v847_v13, 0.0 }
 0x19a   :  { %v1169_v33 = vpack.c.bf16 %v849_v17, %v848_v14  ;;  %v1174_v30 = vpack.c.bf16 %v851_v21, %v850_v18  ;;  %v1179_v38 = vpack.c.bf16 %v853_v25, %v852_v22  ;;  %v1184_v44 = vpack.c.bf16 %v855_v47, %v854_v26 }
 0x19b   :  { %v1189_v56 = vpack.c.bf16 %v857_v59, %v856_v51  ;;  %v1194_v0 = vpack.c.bf16 %v859_v9, %v858_v1  ;;  %v1199_v12 = vpack.c.bf16 %v861_v23, %v860_v15  ;;  %v1204_v20 = vpack.c.bf16 %v863_v37, %v862_v29 }
 0x19c   :  { %1170 = vst [vmem:[%s1783_s4] sm:$0xff] %v1169_v33   ;;  %1246 = vst [vmem:[%s1783_s4 + $0x8] sm:$0xff] %v1174_v30   ;;  %v1209_v32 = vpack.c.bf16 %v865_v55, %v864_v43  ;;  %v1214_v34 = vpack.c.bf16 %v867_v11, %v866_v63  ;;  %v1219_v40 = vpack.c.bf16 %v869_v31, %v868_v19 }
 0x19d   :  { %1247 = vst [vmem:[%s1783_s4 + $0x10] sm:$0xff] %v1179_v38   ;;  %1248 = vst [vmem:[%s1783_s4 + $0x18] sm:$0xff] %v1184_v44   ;;  %v1224_v35 = vpack.c.bf16 %v871_v52, %v870_v48  ;;  %v1229_v36 = vpack.c.bf16 %v873_v2, %v872_v60  ;;  %v1234_v41 = vpack.c.bf16 %v875_v27, %v874_v39 }
 0x19e   :  { %1249 = vst [vmem:[%s1783_s4 + $0x20] sm:$0xff] %v1189_v56   ;;  %1250 = vst [vmem:[%s1783_s4 + $0x28] sm:$0xff] %v1194_v0   ;;  %v1239_v42 = vpack.c.bf16 %v877_v16, %v876_v10  ;;  %v1244_v45 = vpack.c.bf16 %v879_v24, %v878_v28 }
 0x19f   :  { %1251 = vst [vmem:[%s1783_s4 + $0x30] sm:$0xff] %v1199_v12   ;;  %1252 = vst [vmem:[%s1783_s4 + $0x38] sm:$0xff] %v1204_v20  }
 0x1a0   :  { %1253 = vst [vmem:[%s1783_s4 + $0x40] sm:$0xff] %v1209_v32   ;;  %1254 = vst [vmem:[%s1783_s4 + $0x48] sm:$0xff] %v1214_v34  }
 0x1a1   :  { %1255 = vst [vmem:[%s1783_s4 + $0x50] sm:$0xff] %v1219_v40   ;;  %1256 = vst [vmem:[%s1783_s4 + $0x58] sm:$0xff] %v1224_v35  }
 0x1a2   :  { %1257 = vst [vmem:[%s1783_s4 + $0x60] sm:$0xff] %v1229_v36   ;;  %1258 = vst [vmem:[%s1783_s4 + $0x68] sm:$0xff] %v1234_v41  }
 0x1a3   :  { %1259 = vst [vmem:[%s1783_s4 + $0x70] sm:$0xff] %v1239_v42   ;;  %1260 = vst [vmem:[%s1783_s4 + $0x78] sm:$0xff] %v1244_v45  }

</bundles_post_ra>
